<compile_context>
chip_gen: v5e
topology: v5e:2x2
jax: 0.10.0
libtpu: 0.0.40
codegen_flags: <defaults>
</compile_context>

<pallas_src>
import functools

import jax
import jax.numpy as jnp
from jax import lax
from jax.experimental import pallas as pl
from jax.experimental.pallas import tpu as pltpu


# ----------------------------------------------------------------------------
# Fused Linear (+BatchNorm1d) (+affine / bias) (+ReLU) kernel
# ----------------------------------------------------------------------------
def _fused_block_kernel(x_ref, w_ref, gamma_ref, beta_ref, o_ref, acc_ref, *,
                        use_bn: bool, use_relu: bool, eps: float):
    k = pl.program_id(1)

    @pl.when(k == 0)
    def _():
        acc_ref[...] = jnp.zeros_like(acc_ref)

    # (B, TK) @ (TK, TN) -> f32 accumulate on the MXU.
    acc_ref[...] += jnp.dot(x_ref[...], w_ref[...],
                            preferred_element_type=jnp.float32)

    @pl.when(k == pl.num_programs(1) - 1)
    def _():
        y = acc_ref[...]
        if use_bn:
            # Training-mode BatchNorm1d: biased batch statistics per output feature.
            mean = jnp.mean(y, axis=0, keepdims=True)
            centered = y - mean
            var = jnp.mean(centered * centered, axis=0, keepdims=True)
            y = centered * lax.rsqrt(var + eps)
        # Affine (BN weight/bias) or plain Linear bias; identity when gamma=1, beta=0.
        y = y * gamma_ref[...] + beta_ref[...]
        if use_relu:
            y = jnp.maximum(y, 0.0)
        o_ref[...] = y.astype(o_ref.dtype)


def _pick_tile(dim: int, candidates) -> int:
    for c in candidates:
        if dim >= c and dim % c == 0:
            return c
    return dim


def fused_linear_bn_act(x, w, gamma, beta, *, use_bn: bool, use_relu: bool,
                        eps: float = 1e-5):
    """y = act(bn(x @ w)) * gamma + beta, fully fused in one pallas_call."""
    B, K = x.shape
    K2, N = w.shape
    assert K == K2, (x.shape, w.shape)

    tn = _pick_tile(N, (256, 128))
    tk = _pick_tile(K, (512, 256, 128))
    grid = (N // tn, K // tk)

    kernel = functools.partial(_fused_block_kernel,
                               use_bn=use_bn, use_relu=use_relu, eps=eps)

    return pl.pallas_call(
        kernel,
        out_shape=jax.ShapeDtypeStruct((B, N), jnp.float32),
        grid_spec=pltpu.PrefetchScalarGridSpec(
            num_scalar_prefetch=0,
            grid=grid,
            in_specs=[
                pl.BlockSpec((B, tk), lambda j, k: (0, k)),    # activations
                pl.BlockSpec((tk, tn), lambda j, k: (k, j)),   # weights (K, N)
                pl.BlockSpec((1, tn), lambda j, k: (0, j)),    # scale
                pl.BlockSpec((1, tn), lambda j, k: (0, j)),    # shift
            ],
            out_specs=pl.BlockSpec((B, tn), lambda j, k: (0, j)),
            scratch_shapes=[pltpu.VMEM((B, tn), jnp.float32)],
        ),
        compiler_params=pltpu.CompilerParams(
            dimension_semantics=("parallel", "arbitrary")),
    )(x, w, gamma.reshape(1, -1), beta.reshape(1, -1))


# ----------------------------------------------------------------------------
# SimSiam forward (Identity backbone) built from the fused kernels
# ----------------------------------------------------------------------------
def _heads(params, f):
    # Projection MLP (3 blocks).
    z = fused_linear_bn_act(f, params["proj_w1"], params["proj_g1"], params["proj_b1"],
                            use_bn=True, use_relu=True)
    z = fused_linear_bn_act(z, params["proj_w2"], params["proj_g2"], params["proj_b2"],
                            use_bn=True, use_relu=True)
    z = fused_linear_bn_act(z, params["proj_w3"], params["proj_g3"], params["proj_b3"],
                            use_bn=True, use_relu=False)      # BN affine=False
    # Prediction MLP (2 blocks).
    p = fused_linear_bn_act(z, params["pred_w1"], params["pred_g1"], params["pred_b1"],
                            use_bn=True, use_relu=True)
    p = fused_linear_bn_act(p, params["pred_w2"], params["pred_g2"], params["pred_b2"],
                            use_bn=False, use_relu=False)     # plain Linear with bias
    return z, p


def simsiam_forward(params, x0, x1=None, return_features=False):
    """SimSiam forward: ((z0, p0), (z1, p1)). Backbone = Identity (flatten)."""
    f0 = x0.reshape(x0.shape[0], -1)
    z0, p0 = _heads(params, f0)
    out0 = ((z0, p0), f0) if return_features else (z0, p0)
    if x1 is None:
        return out0
    f1 = x1.reshape(x1.shape[0], -1)
    z1, p1 = _heads(params, f1)
    out1 = ((z1, p1), f1) if return_features else (z1, p1)
    return out0, out1


# ----------------------------------------------------------------------------
# Pure-JAX reference for verification
# ----------------------------------------------------------------------------
def _block_ref(x, w, g, b, use_bn, use_relu, eps=1e-5):
    y = jnp.dot(x, w, precision=lax.Precision.HIGHEST)
    if use_bn:
        mean = jnp.mean(y, axis=0, keepdims=True)
        var = jnp.mean((y - mean) ** 2, axis=0, keepdims=True)
        y = (y - mean) / jnp.sqrt(var + eps)
    y = y * g + b
    if use_relu:
        y = jnp.maximum(y, 0.0)
    return y


def _simsiam_ref(params, x0, x1):
    def head(f):
        z = _block_ref(f, params["proj_w1"], params["proj_g1"], params["proj_b1"], True, True)
        z = _block_ref(z, params["proj_w2"], params["proj_g2"], params["proj_b2"], True, True)
        z = _block_ref(z, params["proj_w3"], params["proj_g3"], params["proj_b3"], True, False)
        p = _block_ref(z, params["pred_w1"], params["pred_g1"], params["pred_b1"], True, True)
        p = _block_ref(p, params["pred_w2"], params["pred_g2"], params["pred_b2"], False, False)
        return z, p

    f0 = x0.reshape(x0.shape[0], -1)
    f1 = x1.reshape(x1.shape[0], -1)
    return head(f0), head(f1)


# ----------------------------------------------------------------------------
# Parameter construction (weights stored as (in, out); BN gamma/beta per feature)
# ----------------------------------------------------------------------------
def init_params(key, num_ftrs=128, proj_hidden=128, out_dim=128, pred_hidden=32):
    ks = jax.random.split(key, 16)

    def lin(k, i, o):
        return jax.random.normal(k, (i, o), jnp.float32) * (1.0 / float(i) ** 0.5)

    def affine(kg, kb, n):
        g = 1.0 + 0.1 * jax.random.normal(kg, (n,), jnp.float32)
        b = 0.1 * jax.random.normal(kb, (n,), jnp.float32)
        return g, b

    g1, b1 = affine(ks[1], ks[2], proj_hidden)
    g2, b2 = affine(ks[4], ks[5], proj_hidden)
    g4, b4 = affine(ks[8], ks[9], pred_hidden)
    return {
        "proj_w1": lin(ks[0], num_ftrs, proj_hidden),
        "proj_g1": g1, "proj_b1": b1,
        "proj_w2": lin(ks[3], proj_hidden, proj_hidden),
        "proj_g2": g2, "proj_b2": b2,
        "proj_w3": lin(ks[6], proj_hidden, out_dim),
        "proj_g3": jnp.ones((out_dim,), jnp.float32),      # BN affine=False
        "proj_b3": jnp.zeros((out_dim,), jnp.float32),
        "pred_w1": lin(ks[7], out_dim, pred_hidden),
        "pred_g1": g4, "pred_b1": b4,
        "pred_w2": lin(ks[10], pred_hidden, out_dim),
        "pred_g2": jnp.ones((out_dim,), jnp.float32),      # no BN on output fc
        "pred_b2": 0.1 * jax.random.normal(ks[11], (out_dim,), jnp.float32),  # Linear bias
    }


if __name__ == "__main__":
    key = jax.random.PRNGKey(0)
    kx0, kx1, kp = jax.random.split(key, 3)

    # x: bsz x channels x W x H ; Identity backbone + flatten -> num_ftrs = 8*4*4 = 128
    B, C, H, W = 8, 8, 4, 4
    x0 = jax.random.normal(kx0, (B, C, H, W), jnp.float32)
    x1 = jax.random.normal(kx1, (B, C, H, W), jnp.float32)
    params = init_params(kp, num_ftrs=C * H * W, proj_hidden=128, out_dim=128,
                         pred_hidden=32)

    fwd = jax.jit(simsiam_forward)
    (z0, p0), (z1, p1) = fwd(params, x0, x1)
    jax.block_until_ready((z0, p0, z1, p1))

    (rz0, rp0), (rz1, rp1) = _simsiam_ref(params, x0, x1)
    for got, want in ((z0, rz0), (p0, rp0), (z1, rz1), (p1, rp1)):
        assert got.shape == want.shape, (got.shape, want.shape)
        assert jnp.allclose(got, want, rtol=2e-3, atol=2e-3), float(
            jnp.max(jnp.abs(got - want)))

    print("KERNEL_OK")
</pallas_src>

<mosaic_0001>
module attributes {stable_mosaic.version = 11 : i64} {
  func.func @_fused_block_kernel(%arg0: i32, %arg1: i32, %arg2: memref<8x128xf32, #tpu.memory_space<vmem>>, %arg3: memref<128x128xf32, #tpu.memory_space<vmem>>, %arg4: memref<1x128xf32, #tpu.memory_space<vmem>>, %arg5: memref<1x128xf32, #tpu.memory_space<vmem>>, %arg6: memref<8x128xf32, #tpu.memory_space<vmem>>, %arg7: memref<8x128xf32, #tpu.memory_space<vmem>>) attributes {dimension_semantics = [#tpu.dimension_semantics<parallel>, #tpu.dimension_semantics<arbitrary>], iteration_bounds = array<i64: 1, 1>, scalar_prefetch = 0 : i64, scratch_operands = 1 : i64, tpu.core_type = #tpu.core_type<tc>, window_params = [{transform_indices = @transform_0, window_bounds = array<i64: 8, 128>}, {transform_indices = @transform_1, window_bounds = array<i64: 128, 128>}, {transform_indices = @transform_2, window_bounds = array<i64: 1, 128>}, {transform_indices = @transform_3, window_bounds = array<i64: 1, 128>}, {transform_indices = @transform_4, window_bounds = array<i64: 8, 128>}]} {
    %c0_i32 = arith.constant 0 : i32
    %0 = arith.cmpi eq, %arg1, %c0_i32 : i32
    %1 = arith.extui %0 : i1 to i32
    %c0_i32_0 = arith.constant 0 : i32
    %2 = arith.cmpi ne, %1, %c0_i32_0 : i32
    scf.if %2 {
      %cst_10 = arith.constant 0.000000e+00 : f32
      %12 = vector.broadcast %cst_10 : f32 to vector<8x128xf32>
      %c0_11 = arith.constant 0 : index
      %c0_12 = arith.constant 0 : index
      %13 = vector.load %arg7[%c0_11, %c0_12] : memref<8x128xf32, #tpu.memory_space<vmem>>, vector<8x128xf32>
      tpu.vector_store %arg7[%c0_11, %c0_12], %12 {strides = array<i32>} : memref<8x128xf32, #tpu.memory_space<vmem>>, vector<8x128xf32>,
    } else {
    }
    %c0 = arith.constant 0 : index
    %c0_1 = arith.constant 0 : index
    %3 = vector.load %arg7[%c0, %c0_1] : memref<8x128xf32, #tpu.memory_space<vmem>>, vector<8x128xf32>
    %c0_2 = arith.constant 0 : index
    %c0_3 = arith.constant 0 : index
    %4 = vector.load %arg2[%c0_2, %c0_3] : memref<8x128xf32, #tpu.memory_space<vmem>>, vector<8x128xf32>
    %c0_4 = arith.constant 0 : index
    %c0_5 = arith.constant 0 : index
    %5 = vector.load %arg3[%c0_4, %c0_5] : memref<128x128xf32, #tpu.memory_space<vmem>>, vector<128x128xf32>
    %cst = arith.constant dense<0.000000e+00> : vector<8x128xf32>
    %6 = tpu.matmul %4, %5, %cst {dimension_numbers = #tpu.dot_dimension_numbers<[1], [0], [0], [1], [0, 0, 1, 1], [], []>} : vector<8x128xf32>, vector<128x128xf32>, vector<8x128xf32> -> vector<8x128xf32>
    %7 = arith.addf %3, %6 : vector<8x128xf32>
    %c0_6 = arith.constant 0 : index
    %c0_7 = arith.constant 0 : index
    %8 = vector.load %arg7[%c0_6, %c0_7] : memref<8x128xf32, #tpu.memory_space<vmem>>, vector<8x128xf32>
    tpu.vector_store %arg7[%c0_6, %c0_7], %7 {strides = array<i32>} : memref<8x128xf32, #tpu.memory_space<vmem>>, vector<8x128xf32>,
    %c0_i32_8 = arith.constant 0 : i32
    %9 = arith.cmpi eq, %arg1, %c0_i32_8 : i32
    %10 = arith.extui %9 : i1 to i32
    %c0_i32_9 = arith.constant 0 : i32
    %11 = arith.cmpi ne, %10, %c0_i32_9 : i32
    scf.if %11 {
      %c0_10 = arith.constant 0 : index
      %c0_11 = arith.constant 0 : index
      %12 = vector.load %arg7[%c0_10, %c0_11] : memref<8x128xf32, #tpu.memory_space<vmem>>, vector<8x128xf32>
      %cst_12 = arith.constant dense<0.000000e+00> : vector<128xf32>
      %13 = vector.multi_reduction <add>, %12, %cst_12 [0] : vector<8x128xf32> to vector<128xf32>
      %14 = vector.shape_cast %13 : vector<128xf32> to vector<1x128xf32>
      %cst_13 = arith.constant 8.000000e+00 : f32
      %15 = vector.broadcast %cst_13 : f32 to vector<1x128xf32>
      %16 = arith.divf %14, %15 : vector<1x128xf32>
      %17 = vector.broadcast %16 : vector<1x128xf32> to vector<8x128xf32>
      %18 = arith.subf %12, %17 : vector<8x128xf32>
      %19 = arith.mulf %18, %18 : vector<8x128xf32>
      %cst_14 = arith.constant dense<0.000000e+00> : vector<128xf32>
      %20 = vector.multi_reduction <add>, %19, %cst_14 [0] : vector<8x128xf32> to vector<128xf32>
      %21 = vector.shape_cast %20 : vector<128xf32> to vector<1x128xf32>
      %cst_15 = arith.constant 8.000000e+00 : f32
      %22 = vector.broadcast %cst_15 : f32 to vector<1x128xf32>
      %23 = arith.divf %21, %22 : vector<1x128xf32>
      %cst_16 = arith.constant 9.99999974E-6 : f32
      %24 = vector.broadcast %cst_16 : f32 to vector<1x128xf32>
      %25 = arith.addf %23, %24 : vector<1x128xf32>
      %26 = math.rsqrt %25 : vector<1x128xf32>
      %27 = vector.broadcast %26 : vector<1x128xf32> to vector<8x128xf32>
      %28 = arith.mulf %18, %27 : vector<8x128xf32>
      %c0_17 = arith.constant 0 : index
      %c0_18 = arith.constant 0 : index
      %29 = vector.load %arg4[%c0_17, %c0_18] : memref<1x128xf32, #tpu.memory_space<vmem>>, vector<1x128xf32>
      %30 = vector.broadcast %29 : vector<1x128xf32> to vector<8x128xf32>
      %31 = arith.mulf %28, %30 : vector<8x128xf32>
      %c0_19 = arith.constant 0 : index
      %c0_20 = arith.constant 0 : index
      %32 = vector.load %arg5[%c0_19, %c0_20] : memref<1x128xf32, #tpu.memory_space<vmem>>, vector<1x128xf32>
      %33 = vector.broadcast %32 : vector<1x128xf32> to vector<8x128xf32>
      %34 = arith.addf %31, %33 : vector<8x128xf32>
      %cst_21 = arith.constant 0.000000e+00 : f32
      %35 = vector.broadcast %cst_21 : f32 to vector<8x128xf32>
      %36 = arith.maximumf %34, %35 : vector<8x128xf32>
      %c0_22 = arith.constant 0 : index
      %c0_23 = arith.constant 0 : index
      %37 = vector.load %arg6[%c0_22, %c0_23] : memref<8x128xf32, #tpu.memory_space<vmem>>, vector<8x128xf32>
      tpu.vector_store %arg6[%c0_22, %c0_23], %36 {strides = array<i32>} : memref<8x128xf32, #tpu.memory_space<vmem>>, vector<8x128xf32>,
    } else {
    }
    return
  }
  func.func @transform_0(%arg0: i32, %arg1: i32) -> (i32, i32) {
    %c0_i32 = arith.constant 0 : i32
    %c0_i32_0 = arith.constant 0 : i32
    return %c0_i32, %arg1 : i32, i32
  }
  func.func @transform_1(%arg0: i32, %arg1: i32) -> (i32, i32) {
    %c0_i32 = arith.constant 0 : i32
    return %arg1, %arg0 : i32, i32
  }
  func.func @transform_2(%arg0: i32, %arg1: i32) -> (i32, i32) {
    %c0_i32 = arith.constant 0 : i32
    %c0_i32_0 = arith.constant 0 : i32
    return %c0_i32, %arg0 : i32, i32
  }
  func.func @transform_3(%arg0: i32, %arg1: i32) -> (i32, i32) {
    %c0_i32 = arith.constant 0 : i32
    %c0_i32_0 = arith.constant 0 : i32
    return %c0_i32, %arg0 : i32, i32
  }
  func.func @transform_4(%arg0: i32, %arg1: i32) -> (i32, i32) {
    %c0_i32 = arith.constant 0 : i32
    %c0_i32_0 = arith.constant 0 : i32
    return %c0_i32, %arg0 : i32, i32
  }
}

module attributes {stable_mosaic.version = 11 : i64} {
  func.func @_fused_block_kernel(%arg0: i32, %arg1: i32, %arg2: memref<8x128xf32, #tpu.memory_space<vmem>>, %arg3: memref<128x128xf32, #tpu.memory_space<vmem>>, %arg4: memref<1x128xf32, #tpu.memory_space<vmem>>, %arg5: memref<1x128xf32, #tpu.memory_space<vmem>>, %arg6: memref<8x128xf32, #tpu.memory_space<vmem>>, %arg7: memref<8x128xf32, #tpu.memory_space<vmem>>) attributes {dimension_semantics = [#tpu.dimension_semantics<parallel>, #tpu.dimension_semantics<arbitrary>], iteration_bounds = array<i64: 1, 1>, scalar_prefetch = 0 : i64, scratch_operands = 1 : i64, tpu.core_type = #tpu.core_type<tc>, window_params = [{transform_indices = @transform_0, window_bounds = array<i64: 8, 128>}, {transform_indices = @transform_1, window_bounds = array<i64: 128, 128>}, {transform_indices = @transform_2, window_bounds = array<i64: 1, 128>}, {transform_indices = @transform_3, window_bounds = array<i64: 1, 128>}, {transform_indices = @transform_4, window_bounds = array<i64: 8, 128>}]} {
    %c0_i32 = arith.constant 0 : i32
    %0 = arith.cmpi eq, %arg1, %c0_i32 : i32
    %1 = arith.extui %0 : i1 to i32
    %c0_i32_0 = arith.constant 0 : i32
    %2 = arith.cmpi ne, %1, %c0_i32_0 : i32
    scf.if %2 {
      %cst_10 = arith.constant 0.000000e+00 : f32
      %12 = vector.broadcast %cst_10 : f32 to vector<8x128xf32>
      %c0_11 = arith.constant 0 : index
      %c0_12 = arith.constant 0 : index
      %13 = vector.load %arg7[%c0_11, %c0_12] : memref<8x128xf32, #tpu.memory_space<vmem>>, vector<8x128xf32>
      tpu.vector_store %arg7[%c0_11, %c0_12], %12 {strides = array<i32>} : memref<8x128xf32, #tpu.memory_space<vmem>>, vector<8x128xf32>,
    } else {
    }
    %c0 = arith.constant 0 : index
    %c0_1 = arith.constant 0 : index
    %3 = vector.load %arg7[%c0, %c0_1] : memref<8x128xf32, #tpu.memory_space<vmem>>, vector<8x128xf32>
    %c0_2 = arith.constant 0 : index
    %c0_3 = arith.constant 0 : index
    %4 = vector.load %arg2[%c0_2, %c0_3] : memref<8x128xf32, #tpu.memory_space<vmem>>, vector<8x128xf32>
    %c0_4 = arith.constant 0 : index
    %c0_5 = arith.constant 0 : index
    %5 = vector.load %arg3[%c0_4, %c0_5] : memref<128x128xf32, #tpu.memory_space<vmem>>, vector<128x128xf32>
    %cst = arith.constant dense<0.000000e+00> : vector<8x128xf32>
    %6 = tpu.matmul %4, %5, %cst {dimension_numbers = #tpu.dot_dimension_numbers<[1], [0], [0], [1], [0, 0, 1, 1], [], []>} : vector<8x128xf32>, vector<128x128xf32>, vector<8x128xf32> -> vector<8x128xf32>
    %7 = arith.addf %3, %6 : vector<8x128xf32>
    %c0_6 = arith.constant 0 : index
    %c0_7 = arith.constant 0 : index
    %8 = vector.load %arg7[%c0_6, %c0_7] : memref<8x128xf32, #tpu.memory_space<vmem>>, vector<8x128xf32>
    tpu.vector_store %arg7[%c0_6, %c0_7], %7 {strides = array<i32>} : memref<8x128xf32, #tpu.memory_space<vmem>>, vector<8x128xf32>,
    %c0_i32_8 = arith.constant 0 : i32
    %9 = arith.cmpi eq, %arg1, %c0_i32_8 : i32
    %10 = arith.extui %9 : i1 to i32
    %c0_i32_9 = arith.constant 0 : i32
    %11 = arith.cmpi ne, %10, %c0_i32_9 : i32
    scf.if %11 {
      %c0_10 = arith.constant 0 : index
      %c0_11 = arith.constant 0 : index
      %12 = vector.load %arg7[%c0_10, %c0_11] : memref<8x128xf32, #tpu.memory_space<vmem>>, vector<8x128xf32>
      %cst_12 = arith.constant dense<0.000000e+00> : vector<128xf32>
      %13 = vector.multi_reduction <add>, %12, %cst_12 [0] : vector<8x128xf32> to vector<128xf32>
      %14 = vector.shape_cast %13 : vector<128xf32> to vector<1x128xf32>
      %cst_13 = arith.constant 8.000000e+00 : f32
      %15 = vector.broadcast %cst_13 : f32 to vector<1x128xf32>
      %16 = arith.divf %14, %15 : vector<1x128xf32>
      %17 = vector.broadcast %16 : vector<1x128xf32> to vector<8x128xf32>
      %18 = arith.subf %12, %17 : vector<8x128xf32>
      %19 = arith.mulf %18, %18 : vector<8x128xf32>
      %cst_14 = arith.constant dense<0.000000e+00> : vector<128xf32>
      %20 = vector.multi_reduction <add>, %19, %cst_14 [0] : vector<8x128xf32> to vector<128xf32>
      %21 = vector.shape_cast %20 : vector<128xf32> to vector<1x128xf32>
      %cst_15 = arith.constant 8.000000e+00 : f32
      %22 = vector.broadcast %cst_15 : f32 to vector<1x128xf32>
      %23 = arith.divf %21, %22 : vector<1x128xf32>
      %cst_16 = arith.constant 9.99999974E-6 : f32
      %24 = vector.broadcast %cst_16 : f32 to vector<1x128xf32>
      %25 = arith.addf %23, %24 : vector<1x128xf32>
      %26 = math.rsqrt %25 : vector<1x128xf32>
      %27 = vector.broadcast %26 : vector<1x128xf32> to vector<8x128xf32>
      %28 = arith.mulf %18, %27 : vector<8x128xf32>
      %c0_17 = arith.constant 0 : index
      %c0_18 = arith.constant 0 : index
      %29 = vector.load %arg4[%c0_17, %c0_18] : memref<1x128xf32, #tpu.memory_space<vmem>>, vector<1x128xf32>
      %30 = vector.broadcast %29 : vector<1x128xf32> to vector<8x128xf32>
      %31 = arith.mulf %28, %30 : vector<8x128xf32>
      %c0_19 = arith.constant 0 : index
      %c0_20 = arith.constant 0 : index
      %32 = vector.load %arg5[%c0_19, %c0_20] : memref<1x128xf32, #tpu.memory_space<vmem>>, vector<1x128xf32>
      %33 = vector.broadcast %32 : vector<1x128xf32> to vector<8x128xf32>
      %34 = arith.addf %31, %33 : vector<8x128xf32>
      %c0_21 = arith.constant 0 : index
      %c0_22 = arith.constant 0 : index
      %35 = vector.load %arg6[%c0_21, %c0_22] : memref<8x128xf32, #tpu.memory_space<vmem>>, vector<8x128xf32>
      tpu.vector_store %arg6[%c0_21, %c0_22], %34 {strides = array<i32>} : memref<8x128xf32, #tpu.memory_space<vmem>>, vector<8x128xf32>,
    } else {
    }
    return
  }
  func.func @transform_0(%arg0: i32, %arg1: i32) -> (i32, i32) {
    %c0_i32 = arith.constant 0 : i32
    %c0_i32_0 = arith.constant 0 : i32
    return %c0_i32, %arg1 : i32, i32
  }
  func.func @transform_1(%arg0: i32, %arg1: i32) -> (i32, i32) {
    %c0_i32 = arith.constant 0 : i32
    return %arg1, %arg0 : i32, i32
  }
  func.func @transform_2(%arg0: i32, %arg1: i32) -> (i32, i32) {
    %c0_i32 = arith.constant 0 : i32
    %c0_i32_0 = arith.constant 0 : i32
    return %c0_i32, %arg0 : i32, i32
  }
  func.func @transform_3(%arg0: i32, %arg1: i32) -> (i32, i32) {
    %c0_i32 = arith.constant 0 : i32
    %c0_i32_0 = arith.constant 0 : i32
    return %c0_i32, %arg0 : i32, i32
  }
  func.func @transform_4(%arg0: i32, %arg1: i32) -> (i32, i32) {
    %c0_i32 = arith.constant 0 : i32
    %c0_i32_0 = arith.constant 0 : i32
    return %c0_i32, %arg0 : i32, i32
  }
}

module attributes {stable_mosaic.version = 11 : i64} {
  func.func @_fused_block_kernel(%arg0: i32, %arg1: i32, %arg2: memref<8x128xf32, #tpu.memory_space<vmem>>, %arg3: memref<128x32xf32, #tpu.memory_space<vmem>>, %arg4: memref<1x32xf32, #tpu.memory_space<vmem>>, %arg5: memref<1x32xf32, #tpu.memory_space<vmem>>, %arg6: memref<8x32xf32, #tpu.memory_space<vmem>>, %arg7: memref<8x32xf32, #tpu.memory_space<vmem>>) attributes {dimension_semantics = [#tpu.dimension_semantics<parallel>, #tpu.dimension_semantics<arbitrary>], iteration_bounds = array<i64: 1, 1>, scalar_prefetch = 0 : i64, scratch_operands = 1 : i64, tpu.core_type = #tpu.core_type<tc>, window_params = [{transform_indices = @transform_0, window_bounds = array<i64: 8, 128>}, {transform_indices = @transform_1, window_bounds = array<i64: 128, 32>}, {transform_indices = @transform_2, window_bounds = array<i64: 1, 32>}, {transform_indices = @transform_3, window_bounds = array<i64: 1, 32>}, {transform_indices = @transform_4, window_bounds = array<i64: 8, 32>}]} {
    %c0_i32 = arith.constant 0 : i32
    %0 = arith.cmpi eq, %arg1, %c0_i32 : i32
    %1 = arith.extui %0 : i1 to i32
    %c0_i32_0 = arith.constant 0 : i32
    %2 = arith.cmpi ne, %1, %c0_i32_0 : i32
    scf.if %2 {
      %cst_10 = arith.constant 0.000000e+00 : f32
      %12 = vector.broadcast %cst_10 : f32 to vector<8x32xf32>
      %c0_11 = arith.constant 0 : index
      %c0_12 = arith.constant 0 : index
      %13 = vector.load %arg7[%c0_11, %c0_12] : memref<8x32xf32, #tpu.memory_space<vmem>>, vector<8x32xf32>
      tpu.vector_store %arg7[%c0_11, %c0_12], %12 {strides = array<i32>} : memref<8x32xf32, #tpu.memory_space<vmem>>, vector<8x32xf32>,
    } else {
    }
    %c0 = arith.constant 0 : index
    %c0_1 = arith.constant 0 : index
    %3 = vector.load %arg7[%c0, %c0_1] : memref<8x32xf32, #tpu.memory_space<vmem>>, vector<8x32xf32>
    %c0_2 = arith.constant 0 : index
    %c0_3 = arith.constant 0 : index
    %4 = vector.load %arg2[%c0_2, %c0_3] : memref<8x128xf32, #tpu.memory_space<vmem>>, vector<8x128xf32>
    %c0_4 = arith.constant 0 : index
    %c0_5 = arith.constant 0 : index
    %5 = vector.load %arg3[%c0_4, %c0_5] : memref<128x32xf32, #tpu.memory_space<vmem>>, vector<128x32xf32>
    %cst = arith.constant dense<0.000000e+00> : vector<8x32xf32>
    %6 = tpu.matmul %4, %5, %cst {dimension_numbers = #tpu.dot_dimension_numbers<[1], [0], [0], [1], [0, 0, 1, 1], [], []>} : vector<8x128xf32>, vector<128x32xf32>, vector<8x32xf32> -> vector<8x32xf32>
    %7 = arith.addf %3, %6 : vector<8x32xf32>
    %c0_6 = arith.constant 0 : index
    %c0_7 = arith.constant 0 : index
    %8 = vector.load %arg7[%c0_6, %c0_7] : memref<8x32xf32, #tpu.memory_space<vmem>>, vector<8x32xf32>
    tpu.vector_store %arg7[%c0_6, %c0_7], %7 {strides = array<i32>} : memref<8x32xf32, #tpu.memory_space<vmem>>, vector<8x32xf32>,
    %c0_i32_8 = arith.constant 0 : i32
    %9 = arith.cmpi eq, %arg1, %c0_i32_8 : i32
    %10 = arith.extui %9 : i1 to i32
    %c0_i32_9 = arith.constant 0 : i32
    %11 = arith.cmpi ne, %10, %c0_i32_9 : i32
    scf.if %11 {
      %c0_10 = arith.constant 0 : index
      %c0_11 = arith.constant 0 : index
      %12 = vector.load %arg7[%c0_10, %c0_11] : memref<8x32xf32, #tpu.memory_space<vmem>>, vector<8x32xf32>
      %cst_12 = arith.constant dense<0.000000e+00> : vector<32xf32>
      %13 = vector.multi_reduction <add>, %12, %cst_12 [0] : vector<8x32xf32> to vector<32xf32>
      %14 = vector.shape_cast %13 : vector<32xf32> to vector<1x32xf32>
      %cst_13 = arith.constant 8.000000e+00 : f32
      %15 = vector.broadcast %cst_13 : f32 to vector<1x32xf32>
      %16 = arith.divf %14, %15 : vector<1x32xf32>
      %17 = vector.broadcast %16 : vector<1x32xf32> to vector<8x32xf32>
      %18 = arith.subf %12, %17 : vector<8x32xf32>
      %19 = arith.mulf %18, %18 : vector<8x32xf32>
      %cst_14 = arith.constant dense<0.000000e+00> : vector<32xf32>
      %20 = vector.multi_reduction <add>, %19, %cst_14 [0] : vector<8x32xf32> to vector<32xf32>
      %21 = vector.shape_cast %20 : vector<32xf32> to vector<1x32xf32>
      %cst_15 = arith.constant 8.000000e+00 : f32
      %22 = vector.broadcast %cst_15 : f32 to vector<1x32xf32>
      %23 = arith.divf %21, %22 : vector<1x32xf32>
      %cst_16 = arith.constant 9.99999974E-6 : f32
      %24 = vector.broadcast %cst_16 : f32 to vector<1x32xf32>
      %25 = arith.addf %23, %24 : vector<1x32xf32>
      %26 = math.rsqrt %25 : vector<1x32xf32>
      %27 = vector.broadcast %26 : vector<1x32xf32> to vector<8x32xf32>
      %28 = arith.mulf %18, %27 : vector<8x32xf32>
      %c0_17 = arith.constant 0 : index
      %c0_18 = arith.constant 0 : index
      %29 = vector.load %arg4[%c0_17, %c0_18] : memref<1x32xf32, #tpu.memory_space<vmem>>, vector<1x32xf32>
      %30 = vector.broadcast %29 : vector<1x32xf32> to vector<8x32xf32>
      %31 = arith.mulf %28, %30 : vector<8x32xf32>
      %c0_19 = arith.constant 0 : index
      %c0_20 = arith.constant 0 : index
      %32 = vector.load %arg5[%c0_19, %c0_20] : memref<1x32xf32, #tpu.memory_space<vmem>>, vector<1x32xf32>
      %33 = vector.broadcast %32 : vector<1x32xf32> to vector<8x32xf32>
      %34 = arith.addf %31, %33 : vector<8x32xf32>
      %cst_21 = arith.constant 0.000000e+00 : f32
      %35 = vector.broadcast %cst_21 : f32 to vector<8x32xf32>
      %36 = arith.maximumf %34, %35 : vector<8x32xf32>
      %c0_22 = arith.constant 0 : index
      %c0_23 = arith.constant 0 : index
      %37 = vector.load %arg6[%c0_22, %c0_23] : memref<8x32xf32, #tpu.memory_space<vmem>>, vector<8x32xf32>
      tpu.vector_store %arg6[%c0_22, %c0_23], %36 {strides = array<i32>} : memref<8x32xf32, #tpu.memory_space<vmem>>, vector<8x32xf32>,
    } else {
    }
    return
  }
  func.func @transform_0(%arg0: i32, %arg1: i32) -> (i32, i32) {
    %c0_i32 = arith.constant 0 : i32
    %c0_i32_0 = arith.constant 0 : i32
    return %c0_i32, %arg1 : i32, i32
  }
  func.func @transform_1(%arg0: i32, %arg1: i32) -> (i32, i32) {
    %c0_i32 = arith.constant 0 : i32
    return %arg1, %arg0 : i32, i32
  }
  func.func @transform_2(%arg0: i32, %arg1: i32) -> (i32, i32) {
    %c0_i32 = arith.constant 0 : i32
    %c0_i32_0 = arith.constant 0 : i32
    return %c0_i32, %arg0 : i32, i32
  }
  func.func @transform_3(%arg0: i32, %arg1: i32) -> (i32, i32) {
    %c0_i32 = arith.constant 0 : i32
    %c0_i32_0 = arith.constant 0 : i32
    return %c0_i32, %arg0 : i32, i32
  }
  func.func @transform_4(%arg0: i32, %arg1: i32) -> (i32, i32) {
    %c0_i32 = arith.constant 0 : i32
    %c0_i32_0 = arith.constant 0 : i32
    return %c0_i32, %arg0 : i32, i32
  }
}

module attributes {stable_mosaic.version = 11 : i64} {
  func.func @_fused_block_kernel(%arg0: i32, %arg1: i32, %arg2: memref<8x32xf32, #tpu.memory_space<vmem>>, %arg3: memref<32x128xf32, #tpu.memory_space<vmem>>, %arg4: memref<1x128xf32, #tpu.memory_space<vmem>>, %arg5: memref<1x128xf32, #tpu.memory_space<vmem>>, %arg6: memref<8x128xf32, #tpu.memory_space<vmem>>, %arg7: memref<8x128xf32, #tpu.memory_space<vmem>>) attributes {dimension_semantics = [#tpu.dimension_semantics<parallel>, #tpu.dimension_semantics<arbitrary>], iteration_bounds = array<i64: 1, 1>, scalar_prefetch = 0 : i64, scratch_operands = 1 : i64, tpu.core_type = #tpu.core_type<tc>, window_params = [{transform_indices = @transform_0, window_bounds = array<i64: 8, 32>}, {transform_indices = @transform_1, window_bounds = array<i64: 32, 128>}, {transform_indices = @transform_2, window_bounds = array<i64: 1, 128>}, {transform_indices = @transform_3, window_bounds = array<i64: 1, 128>}, {transform_indices = @transform_4, window_bounds = array<i64: 8, 128>}]} {
    %c0_i32 = arith.constant 0 : i32
    %0 = arith.cmpi eq, %arg1, %c0_i32 : i32
    %1 = arith.extui %0 : i1 to i32
    %c0_i32_0 = arith.constant 0 : i32
    %2 = arith.cmpi ne, %1, %c0_i32_0 : i32
    scf.if %2 {
      %cst_10 = arith.constant 0.000000e+00 : f32
      %12 = vector.broadcast %cst_10 : f32 to vector<8x128xf32>
      %c0_11 = arith.constant 0 : index
      %c0_12 = arith.constant 0 : index
      %13 = vector.load %arg7[%c0_11, %c0_12] : memref<8x128xf32, #tpu.memory_space<vmem>>, vector<8x128xf32>
      tpu.vector_store %arg7[%c0_11, %c0_12], %12 {strides = array<i32>} : memref<8x128xf32, #tpu.memory_space<vmem>>, vector<8x128xf32>,
    } else {
    }
    %c0 = arith.constant 0 : index
    %c0_1 = arith.constant 0 : index
    %3 = vector.load %arg7[%c0, %c0_1] : memref<8x128xf32, #tpu.memory_space<vmem>>, vector<8x128xf32>
    %c0_2 = arith.constant 0 : index
    %c0_3 = arith.constant 0 : index
    %4 = vector.load %arg2[%c0_2, %c0_3] : memref<8x32xf32, #tpu.memory_space<vmem>>, vector<8x32xf32>
    %c0_4 = arith.constant 0 : index
    %c0_5 = arith.constant 0 : index
    %5 = vector.load %arg3[%c0_4, %c0_5] : memref<32x128xf32, #tpu.memory_space<vmem>>, vector<32x128xf32>
    %cst = arith.constant dense<0.000000e+00> : vector<8x128xf32>
    %6 = tpu.matmul %4, %5, %cst {dimension_numbers = #tpu.dot_dimension_numbers<[1], [0], [0], [1], [0, 0, 1, 1], [], []>} : vector<8x32xf32>, vector<32x128xf32>, vector<8x128xf32> -> vector<8x128xf32>
    %7 = arith.addf %3, %6 : vector<8x128xf32>
    %c0_6 = arith.constant 0 : index
    %c0_7 = arith.constant 0 : index
    %8 = vector.load %arg7[%c0_6, %c0_7] : memref<8x128xf32, #tpu.memory_space<vmem>>, vector<8x128xf32>
    tpu.vector_store %arg7[%c0_6, %c0_7], %7 {strides = array<i32>} : memref<8x128xf32, #tpu.memory_space<vmem>>, vector<8x128xf32>,
    %c0_i32_8 = arith.constant 0 : i32
    %9 = arith.cmpi eq, %arg1, %c0_i32_8 : i32
    %10 = arith.extui %9 : i1 to i32
    %c0_i32_9 = arith.constant 0 : i32
    %11 = arith.cmpi ne, %10, %c0_i32_9 : i32
    scf.if %11 {
      %c0_10 = arith.constant 0 : index
      %c0_11 = arith.constant 0 : index
      %12 = vector.load %arg7[%c0_10, %c0_11] : memref<8x128xf32, #tpu.memory_space<vmem>>, vector<8x128xf32>
      %c0_12 = arith.constant 0 : index
      %c0_13 = arith.constant 0 : index
      %13 = vector.load %arg4[%c0_12, %c0_13] : memref<1x128xf32, #tpu.memory_space<vmem>>, vector<1x128xf32>
      %14 = vector.broadcast %13 : vector<1x128xf32> to vector<8x128xf32>
      %15 = arith.mulf %12, %14 : vector<8x128xf32>
      %c0_14 = arith.constant 0 : index
      %c0_15 = arith.constant 0 : index
      %16 = vector.load %arg5[%c0_14, %c0_15] : memref<1x128xf32, #tpu.memory_space<vmem>>, vector<1x128xf32>
      %17 = vector.broadcast %16 : vector<1x128xf32> to vector<8x128xf32>
      %18 = arith.addf %15, %17 : vector<8x128xf32>
      %c0_16 = arith.constant 0 : index
      %c0_17 = arith.constant 0 : index
      %19 = vector.load %arg6[%c0_16, %c0_17] : memref<8x128xf32, #tpu.memory_space<vmem>>, vector<8x128xf32>
      tpu.vector_store %arg6[%c0_16, %c0_17], %18 {strides = array<i32>} : memref<8x128xf32, #tpu.memory_space<vmem>>, vector<8x128xf32>,
    } else {
    }
    return
  }
  func.func @transform_0(%arg0: i32, %arg1: i32) -> (i32, i32) {
    %c0_i32 = arith.constant 0 : i32
    %c0_i32_0 = arith.constant 0 : i32
    return %c0_i32, %arg1 : i32, i32
  }
  func.func @transform_1(%arg0: i32, %arg1: i32) -> (i32, i32) {
    %c0_i32 = arith.constant 0 : i32
    return %arg1, %arg0 : i32, i32
  }
  func.func @transform_2(%arg0: i32, %arg1: i32) -> (i32, i32) {
    %c0_i32 = arith.constant 0 : i32
    %c0_i32_0 = arith.constant 0 : i32
    return %c0_i32, %arg0 : i32, i32
  }
  func.func @transform_3(%arg0: i32, %arg1: i32) -> (i32, i32) {
    %c0_i32 = arith.constant 0 : i32
    %c0_i32_0 = arith.constant 0 : i32
    return %c0_i32, %arg0 : i32, i32
  }
  func.func @transform_4(%arg0: i32, %arg1: i32) -> (i32, i32) {
    %c0_i32 = arith.constant 0 : i32
    %c0_i32_0 = arith.constant 0 : i32
    return %c0_i32, %arg0 : i32, i32
  }
}

module attributes {stable_mosaic.version = 11 : i64} {
  func.func @_fused_block_kernel(%arg0: i32, %arg1: i32, %arg2: memref<8x128xf32, #tpu.memory_space<vmem>>, %arg3: memref<128x128xf32, #tpu.memory_space<vmem>>, %arg4: memref<1x128xf32, #tpu.memory_space<vmem>>, %arg5: memref<1x128xf32, #tpu.memory_space<vmem>>, %arg6: memref<8x128xf32, #tpu.memory_space<vmem>>, %arg7: memref<8x128xf32, #tpu.memory_space<vmem>>) attributes {dimension_semantics = [#tpu.dimension_semantics<parallel>, #tpu.dimension_semantics<arbitrary>], iteration_bounds = array<i64: 1, 1>, scalar_prefetch = 0 : i64, scratch_operands = 1 : i64, tpu.core_type = #tpu.core_type<tc>, window_params = [{transform_indices = @transform_0, window_bounds = array<i64: 8, 128>}, {transform_indices = @transform_1, window_bounds = array<i64: 128, 128>}, {transform_indices = @transform_2, window_bounds = array<i64: 1, 128>}, {transform_indices = @transform_3, window_bounds = array<i64: 1, 128>}, {transform_indices = @transform_4, window_bounds = array<i64: 8, 128>}]} {
    %c0_i32 = arith.constant 0 : i32
    %0 = arith.cmpi eq, %arg1, %c0_i32 : i32
    %1 = arith.extui %0 : i1 to i32
    %c0_i32_0 = arith.constant 0 : i32
    %2 = arith.cmpi ne, %1, %c0_i32_0 : i32
    scf.if %2 {
      %cst_10 = arith.constant 0.000000e+00 : f32
      %12 = vector.broadcast %cst_10 : f32 to vector<8x128xf32>
      %c0_11 = arith.constant 0 : index
      %c0_12 = arith.constant 0 : index
      %13 = vector.load %arg7[%c0_11, %c0_12] : memref<8x128xf32, #tpu.memory_space<vmem>>, vector<8x128xf32>
      tpu.vector_store %arg7[%c0_11, %c0_12], %12 {strides = array<i32>} : memref<8x128xf32, #tpu.memory_space<vmem>>, vector<8x128xf32>,
    } else {
    }
    %c0 = arith.constant 0 : index
    %c0_1 = arith.constant 0 : index
    %3 = vector.load %arg7[%c0, %c0_1] : memref<8x128xf32, #tpu.memory_space<vmem>>, vector<8x128xf32>
    %c0_2 = arith.constant 0 : index
    %c0_3 = arith.constant 0 : index
    %4 = vector.load %arg2[%c0_2, %c0_3] : memref<8x128xf32, #tpu.memory_space<vmem>>, vector<8x128xf32>
    %c0_4 = arith.constant 0 : index
    %c0_5 = arith.constant 0 : index
    %5 = vector.load %arg3[%c0_4, %c0_5] : memref<128x128xf32, #tpu.memory_space<vmem>>, vector<128x128xf32>
    %cst = arith.constant dense<0.000000e+00> : vector<8x128xf32>
    %6 = tpu.matmul %4, %5, %cst {dimension_numbers = #tpu.dot_dimension_numbers<[1], [0], [0], [1], [0, 0, 1, 1], [], []>} : vector<8x128xf32>, vector<128x128xf32>, vector<8x128xf32> -> vector<8x128xf32>
    %7 = arith.addf %3, %6 : vector<8x128xf32>
    %c0_6 = arith.constant 0 : index
    %c0_7 = arith.constant 0 : index
    %8 = vector.load %arg7[%c0_6, %c0_7] : memref<8x128xf32, #tpu.memory_space<vmem>>, vector<8x128xf32>
    tpu.vector_store %arg7[%c0_6, %c0_7], %7 {strides = array<i32>} : memref<8x128xf32, #tpu.memory_space<vmem>>, vector<8x128xf32>,
    %c0_i32_8 = arith.constant 0 : i32
    %9 = arith.cmpi eq, %arg1, %c0_i32_8 : i32
    %10 = arith.extui %9 : i1 to i32
    %c0_i32_9 = arith.constant 0 : i32
    %11 = arith.cmpi ne, %10, %c0_i32_9 : i32
    scf.if %11 {
      %c0_10 = arith.constant 0 : index
      %c0_11 = arith.constant 0 : index
      %12 = vector.load %arg7[%c0_10, %c0_11] : memref<8x128xf32, #tpu.memory_space<vmem>>, vector<8x128xf32>
      %cst_12 = arith.constant dense<0.000000e+00> : vector<128xf32>
      %13 = vector.multi_reduction <add>, %12, %cst_12 [0] : vector<8x128xf32> to vector<128xf32>
      %14 = vector.shape_cast %13 : vector<128xf32> to vector<1x128xf32>
      %cst_13 = arith.constant 8.000000e+00 : f32
      %15 = vector.broadcast %cst_13 : f32 to vector<1x128xf32>
      %16 = arith.divf %14, %15 : vector<1x128xf32>
      %17 = vector.broadcast %16 : vector<1x128xf32> to vector<8x128xf32>
      %18 = arith.subf %12, %17 : vector<8x128xf32>
      %19 = arith.mulf %18, %18 : vector<8x128xf32>
      %cst_14 = arith.constant dense<0.000000e+00> : vector<128xf32>
      %20 = vector.multi_reduction <add>, %19, %cst_14 [0] : vector<8x128xf32> to vector<128xf32>
      %21 = vector.shape_cast %20 : vector<128xf32> to vector<1x128xf32>
      %cst_15 = arith.constant 8.000000e+00 : f32
      %22 = vector.broadcast %cst_15 : f32 to vector<1x128xf32>
      %23 = arith.divf %21, %22 : vector<1x128xf32>
      %cst_16 = arith.constant 9.99999974E-6 : f32
      %24 = vector.broadcast %cst_16 : f32 to vector<1x128xf32>
      %25 = arith.addf %23, %24 : vector<1x128xf32>
      %26 = math.rsqrt %25 : vector<1x128xf32>
      %27 = vector.broadcast %26 : vector<1x128xf32> to vector<8x128xf32>
      %28 = arith.mulf %18, %27 : vector<8x128xf32>
      %c0_17 = arith.constant 0 : index
      %c0_18 = arith.constant 0 : index
      %29 = vector.load %arg4[%c0_17, %c0_18] : memref<1x128xf32, #tpu.memory_space<vmem>>, vector<1x128xf32>
      %30 = vector.broadcast %29 : vector<1x128xf32> to vector<8x128xf32>
      %31 = arith.mulf %28, %30 : vector<8x128xf32>
      %c0_19 = arith.constant 0 : index
      %c0_20 = arith.constant 0 : index
      %32 = vector.load %arg5[%c0_19, %c0_20] : memref<1x128xf32, #tpu.memory_space<vmem>>, vector<1x128xf32>
      %33 = vector.broadcast %32 : vector<1x128xf32> to vector<8x128xf32>
      %34 = arith.addf %31, %33 : vector<8x128xf32>
      %c0_21 = arith.constant 0 : index
      %c0_22 = arith.constant 0 : index
      %35 = vector.load %arg6[%c0_21, %c0_22] : memref<8x128xf32, #tpu.memory_space<vmem>>, vector<8x128xf32>
      tpu.vector_store %arg6[%c0_21, %c0_22], %34 {strides = array<i32>} : memref<8x128xf32, #tpu.memory_space<vmem>>, vector<8x128xf32>,
    } else {
    }
    return
  }
  func.func @transform_0(%arg0: i32, %arg1: i32) -> (i32, i32) {
    %c0_i32 = arith.constant 0 : i32
    %c0_i32_0 = arith.constant 0 : i32
    return %c0_i32, %arg1 : i32, i32
  }
  func.func @transform_1(%arg0: i32, %arg1: i32) -> (i32, i32) {
    %c0_i32 = arith.constant 0 : i32
    return %arg1, %arg0 : i32, i32
  }
  func.func @transform_2(%arg0: i32, %arg1: i32) -> (i32, i32) {
    %c0_i32 = arith.constant 0 : i32
    %c0_i32_0 = arith.constant 0 : i32
    return %c0_i32, %arg0 : i32, i32
  }
  func.func @transform_3(%arg0: i32, %arg1: i32) -> (i32, i32) {
    %c0_i32 = arith.constant 0 : i32
    %c0_i32_0 = arith.constant 0 : i32
    return %c0_i32, %arg0 : i32, i32
  }
  func.func @transform_4(%arg0: i32, %arg1: i32) -> (i32, i32) {
    %c0_i32 = arith.constant 0 : i32
    %c0_i32_0 = arith.constant 0 : i32
    return %c0_i32, %arg0 : i32, i32
  }
}

</mosaic_0001>

<bundles_post_ra>
// kernel: simsiam_forward.12
= control target key start
LH: loop header
LB: loop body
LE: loop exit
PB: predicated region body
PF: predicated region fallthrough
CT: control target
= control target key end

     0   :  { %9 = vsyncpa [#allocation4], 0  ;;  %s169_s18 = smov [#allocation3]   ;;  %s170_s20 = smov 128   ;;  %s213_s0 = inlined_call_operand.vmem [shape: f32[8,128], index: 0, kind: input, shape index: {}]   ;;  %s214_s1 = inlined_call_operand.hbm [shape: f32[128,128], index: 1, kind: input, shape index: {}]   ;;  %s215_s2 = inlined_call_operand.vmem [shape: f32[1,128], index: 2, kind: input, shape index: {}]   ;;  %s216_s3 = inlined_call_operand.vmem [shape: f32[1,128], index: 3, kind: input, shape index: {}]   ;;  %s217_s4 = inlined_call_operand.vmem [shape: f32[8,128], index: 4, kind: output, shape index: {}]  }
   0x1   :  { %s16_s17 = sshll.u32 %s214_s1, 4  ;;  %s18_s19 = sshll.u32 %s169_s18, 4  ;;  %s17_s17 = int_to_ptr.hbm [resolvable:$true] %s16_s17  ;;  %s19_s19 = int_to_ptr.vmem [resolvable:$true] %s18_s19 }
   0x2   :  { %s171_s21 = smov 8  }
   0x3   :  { %24 = dma.hbm_to_vmem [thread:$0]  %s17_s17, 2048, %s19_s19, [#allocation4], %s170_s20, %s170_s20, %s171_s21  }
   0x4   :  { %167 = dma.done.wait [#allocation4], 2048  }
   0x5   :  { %168 = vsyncadd [#allocation4], 4294965248  ;;  %v55_v0 = vld [vmem:[#allocation3 + $0x78] sm:$0xff]  ;;  %v54_v1 = vld [vmem:[#allocation3 + $0x70] sm:$0xff]  ;;  %v172_v17 = vmov 8.0  }
   0x6   :  { %56 = vmatpush.msra.mxu0 %v55_v0  ;;  %v53_v2 = vld [vmem:[#allocation3 + $0x68] sm:$0xff]  ;;  %v52_v3 = vld [vmem:[#allocation3 + $0x60] sm:$0xff]  ;;  %v51_v4 = vld [vmem:[#allocation3 + $0x58] sm:$0xff]  ;;  %139 = vrcp.f32 %v172_v17 }
   0x7   :  { %v50_v5 = vld [vmem:[#allocation3 + $0x50] sm:$0xff]  ;;  %v49_v6 = vld [vmem:[#allocation3 + $0x48] sm:$0xff]  ;;  %v48_v7 = vld [vmem:[#allocation3 + $0x40] sm:$0xff] }
   0x8   :  { %57 = vmatpush.msra.mxu0 %v54_v1  ;;  %v47_v8 = vld [vmem:[#allocation3 + $0x38] sm:$0xff]  ;;  %v46_v9 = vld [vmem:[#allocation3 + $0x30] sm:$0xff]  ;;  %v45_v10 = vld [vmem:[#allocation3 + $0x28] sm:$0xff] }
   0x9   :  { %v44_v11 = vld [vmem:[#allocation3 + $0x20] sm:$0xff]  ;;  %v43_v12 = vld [vmem:[#allocation3 + $0x18] sm:$0xff]  ;;  %v42_v13 = vld [vmem:[#allocation3 + $0x10] sm:$0xff] }
   0xa   :  { %58 = vmatpush.msra.mxu0 %v53_v2  ;;  %v41_v14 = vld [vmem:[#allocation3 + $0x8] sm:$0xff]  ;;  %v40_v15 = vld [vmem:[#allocation3] sm:$0xff] }
   0xb   :  { %v39_v16 = vld [vmem:[%s213_s0] sm:$0xff] }
   0xc   :  { %59 = vmatpush.msra.mxu0 %v52_v3  ;;  %v140_v18 = vpop.eup %139  ;;  %v137_v48 = vld [vmem:[%s215_s2] ss:$0 sm:$0xff] }
   0xd   :  { %v89_v19 = vmul.f32 8.0, %v140_v18  ;;  %vm93_vm0 = vweird.f32 %v140_v18  ;;  %v138_v51 = vld [vmem:[%s216_s3] ss:$0 sm:$0xff] }
   0xe   :  { %60 = vmatpush.msra.mxu0 %v51_v4 }
   0xf   :  { %v90_v20 = vsub.f32 1.0, %v89_v19 }
  0x10   :  { %61 = vmatpush.msra.mxu0 %v50_v5 }
  0x11   :  { %v91_v23 = vmul.f32 %v140_v18, %v90_v20 }
  0x12   :  { %62 = vmatpush.msra.mxu0 %v49_v6 }
  0x13   :  { %v92_v26 = vadd.f32 %v140_v18, %v91_v23 }
  0x14   :  { %63 = vmatpush.msra.mxu0 %v48_v7 }
  0x15   :  { %v94_v29 = vsel %vm93_vm0, %v140_v18, %v92_v26 }
  0x16   :  { %64 = vmatpush.msra.mxu0 %v47_v8 }
  0x18   :  { %65 = vmatpush.msra.mxu0 %v46_v9 }
  0x1a   :  { %66 = vmatpush.msra.mxu0 %v45_v10 }
  0x1c   :  { %67 = vmatpush.msra.mxu0 %v44_v11 }
  0x1e   :  { %68 = vmatpush.msra.mxu0 %v43_v12 }
  0x20   :  { %69 = vmatpush.msra.mxu0 %v42_v13 }
  0x22   :  { %70 = vmatpush.msra.mxu0 %v41_v14 }
  0x24   :  { %71 = vmatpush.msra.mxu0 %v40_v15 }
  0x25   :  { %72 = vmatmul.f32.vlgmr.msra.gmra.mxu0 %v39_v16 }
  0xa2   :  { %v73_v21 = vpop.f32.mrf.mxu0 }
  0xa3   :  { %v82_v22 = vrot.slane %v73_v21, 4 }
  0xa5   :  { %v83_v24 = vadd.f32 %v82_v22, %v73_v21 }
  0xa7   :  { %v84_v25 = vrot.slane %v83_v24, 2 }
  0xa9   :  { %v85_v27 = vadd.f32 %v84_v25, %v83_v24 }
  0xab   :  { %v86_v28 = vrot.slane %v85_v27, 1 }
  0xad   :  { %v87_v30 = vadd.f32 %v86_v28, %v85_v27 }
  0xaf   :  { %v95_v31 = vmul.f32 %v94_v29, %v87_v30 }
  0xb1   :  { %v96_v32 = vsub.f32 %v73_v21, %v95_v31 }
  0xb3   :  { %v97_v33 = vmul.f32 %v96_v32, %v96_v32 }
  0xb5   :  { %v98_v34 = vrot.slane %v97_v33, 4 }
  0xb7   :  { %v99_v35 = vadd.f32 %v98_v34, %v97_v33 }
  0xb9   :  { %v100_v36 = vrot.slane %v99_v35, 2 }
  0xbb   :  { %v101_v37 = vadd.f32 %v100_v36, %v99_v35 }
  0xbd   :  { %v102_v38 = vrot.slane %v101_v37, 1 }
  0xbf   :  { %v103_v39 = vadd.f32 %v102_v38, %v101_v37 }
  0xc1   :  { %v104_v40 = vmul.f32 %v103_v39, %v94_v29 }
  0xc3   :  { %v105_v41 = vadd.f32 1e-05, %v104_v40 }
  0xc5   :  { %141 = vrsqrt.f32 %v105_v41  ;;  %vm112_vm2 = vweird.f32 %v105_v41 }
  0xcb   :  { %v142_v42 = vpop.eup %141 }
  0xcc   :  { %v107_v43 = vmul.f32 %v142_v42, %v105_v41  ;;  %vm113_vm1 = vweird.f32 %v142_v42 }
  0xcd   :  { %vm114_vm3 = vmor %vm112_vm2, %vm113_vm1 }
  0xce   :  { %v108_v44 = vmul.f32 %v142_v42, %v107_v43 }
  0xd0   :  { %v109_v45 = vmul.f32 0.5, %v108_v44 }
  0xd2   :  { %v110_v46 = vsub.f32 1.5, %v109_v45 }
  0xd4   :  { %v111_v47 = vmul.f32 %v142_v42, %v110_v46 }
  0xd6   :  { %v115_v49 = vsel %vm114_vm3, %v142_v42, %v111_v47 }
  0xd7   :  { %v116_v50 = vmul.f32 %v115_v49, %v96_v32 }
  0xd9   :  { %v121_v52 = vmul.f32 %v137_v48, %v116_v50 }
  0xdb   :  { %v126_v53 = vadd.f32 %v138_v51, %v121_v52 }
  0xdd   :  { %127 = vst [vmem:[%s217_s4] sm:$0xff] %v126_v53 }
  0xde   :  { %132 = vsyncpa [#allocation4], 1 }

// kernel: simsiam_forward.10
= control target key start
LH: loop header
LB: loop body
LE: loop exit
PB: predicated region body
PF: predicated region fallthrough
CT: control target
= control target key end

     0   :  { %v124_v17 = vmov 8.0   ;;  %s210_s1 = inlined_call_operand.vmem [shape: f32[128,128], index: 1, kind: input, shape index: {}]   ;;  %s211_s2 = inlined_call_operand.vmem [shape: f32[1,128], index: 2, kind: input, shape index: {}]   ;;  %s212_s3 = inlined_call_operand.vmem [shape: f32[1,128], index: 3, kind: input, shape index: {}]   ;;  %s213_s0 = inlined_call_operand.vmem [shape: f32[8,128], index: 0, kind: input, shape index: {}]   ;;  %s214_s4 = inlined_call_operand.vmem [shape: f32[8,128], index: 4, kind: output, shape index: {}]  }
   0x1   :  { %v39_v0 = vld [vmem:[%s210_s1 + $0x78] sm:$0xff]  ;;  %v38_v1 = vld [vmem:[%s210_s1 + $0x70] sm:$0xff]  ;;  %v37_v2 = vld [vmem:[%s210_s1 + $0x68] sm:$0xff]  ;;  %120 = vrcp.f32 %v124_v17 }
   0x2   :  { %40 = vmatpush.msra.mxu0 %v39_v0  ;;  %v36_v3 = vld [vmem:[%s210_s1 + $0x60] sm:$0xff]  ;;  %v35_v4 = vld [vmem:[%s210_s1 + $0x58] sm:$0xff]  ;;  %v34_v5 = vld [vmem:[%s210_s1 + $0x50] sm:$0xff] }
   0x3   :  { %v33_v6 = vld [vmem:[%s210_s1 + $0x48] sm:$0xff]  ;;  %v32_v7 = vld [vmem:[%s210_s1 + $0x40] sm:$0xff]  ;;  %v31_v8 = vld [vmem:[%s210_s1 + $0x38] sm:$0xff] }
   0x4   :  { %41 = vmatpush.msra.mxu0 %v38_v1  ;;  %v30_v9 = vld [vmem:[%s210_s1 + $0x30] sm:$0xff]  ;;  %v29_v10 = vld [vmem:[%s210_s1 + $0x28] sm:$0xff]  ;;  %v28_v11 = vld [vmem:[%s210_s1 + $0x20] sm:$0xff] }
   0x5   :  { %v27_v12 = vld [vmem:[%s210_s1 + $0x18] sm:$0xff]  ;;  %v26_v13 = vld [vmem:[%s210_s1 + $0x10] sm:$0xff]  ;;  %v25_v14 = vld [vmem:[%s210_s1 + $0x8] sm:$0xff] }
   0x6   :  { %42 = vmatpush.msra.mxu0 %v37_v2  ;;  %v24_v15 = vld [vmem:[%s210_s1] sm:$0xff] }
   0x7   :  { %v23_v16 = vld [vmem:[%s213_s0] sm:$0xff]  ;;  %v121_v18 = vpop.eup %120 }
   0x8   :  { %43 = vmatpush.msra.mxu0 %v36_v3  ;;  %v73_v19 = vmul.f32 8.0, %v121_v18  ;;  %vm77_vm0 = vweird.f32 %v121_v18  ;;  %v118_v48 = vld [vmem:[%s211_s2] ss:$0 sm:$0xff] }
   0x9   :  { %v119_v51 = vld [vmem:[%s212_s3] ss:$0 sm:$0xff] }
   0xa   :  { %44 = vmatpush.msra.mxu0 %v35_v4  ;;  %v74_v20 = vsub.f32 1.0, %v73_v19 }
   0xc   :  { %45 = vmatpush.msra.mxu0 %v34_v5  ;;  %v75_v23 = vmul.f32 %v121_v18, %v74_v20 }
   0xe   :  { %46 = vmatpush.msra.mxu0 %v33_v6  ;;  %v76_v26 = vadd.f32 %v121_v18, %v75_v23 }
  0x10   :  { %47 = vmatpush.msra.mxu0 %v32_v7  ;;  %v78_v29 = vsel %vm77_vm0, %v121_v18, %v76_v26 }
  0x12   :  { %48 = vmatpush.msra.mxu0 %v31_v8 }
  0x14   :  { %49 = vmatpush.msra.mxu0 %v30_v9 }
  0x16   :  { %50 = vmatpush.msra.mxu0 %v29_v10 }
  0x18   :  { %51 = vmatpush.msra.mxu0 %v28_v11 }
  0x1a   :  { %52 = vmatpush.msra.mxu0 %v27_v12 }
  0x1c   :  { %53 = vmatpush.msra.mxu0 %v26_v13 }
  0x1e   :  { %54 = vmatpush.msra.mxu0 %v25_v14 }
  0x20   :  { %55 = vmatpush.msra.mxu0 %v24_v15 }
  0x21   :  { %56 = vmatmul.f32.vlgmr.msra.gmra.mxu0 %v23_v16 }
  0x9e   :  { %v57_v21 = vpop.f32.mrf.mxu0 }
  0x9f   :  { %v66_v22 = vrot.slane %v57_v21, 4 }
  0xa1   :  { %v67_v24 = vadd.f32 %v66_v22, %v57_v21 }
  0xa3   :  { %v68_v25 = vrot.slane %v67_v24, 2 }
  0xa5   :  { %v69_v27 = vadd.f32 %v68_v25, %v67_v24 }
  0xa7   :  { %v70_v28 = vrot.slane %v69_v27, 1 }
  0xa9   :  { %v71_v30 = vadd.f32 %v70_v28, %v69_v27 }
  0xab   :  { %v79_v31 = vmul.f32 %v78_v29, %v71_v30 }
  0xad   :  { %v80_v32 = vsub.f32 %v57_v21, %v79_v31 }
  0xaf   :  { %v81_v33 = vmul.f32 %v80_v32, %v80_v32 }
  0xb1   :  { %v82_v34 = vrot.slane %v81_v33, 4 }
  0xb3   :  { %v83_v35 = vadd.f32 %v82_v34, %v81_v33 }
  0xb5   :  { %v84_v36 = vrot.slane %v83_v35, 2 }
  0xb7   :  { %v85_v37 = vadd.f32 %v84_v36, %v83_v35 }
  0xb9   :  { %v86_v38 = vrot.slane %v85_v37, 1 }
  0xbb   :  { %v87_v39 = vadd.f32 %v86_v38, %v85_v37 }
  0xbd   :  { %v88_v40 = vmul.f32 %v87_v39, %v78_v29 }
  0xbf   :  { %v89_v41 = vadd.f32 1e-05, %v88_v40 }
  0xc1   :  { %122 = vrsqrt.f32 %v89_v41  ;;  %vm96_vm2 = vweird.f32 %v89_v41 }
  0xc7   :  { %v123_v42 = vpop.eup %122 }
  0xc8   :  { %v91_v43 = vmul.f32 %v123_v42, %v89_v41  ;;  %vm97_vm1 = vweird.f32 %v123_v42 }
  0xc9   :  { %vm98_vm3 = vmor %vm96_vm2, %vm97_vm1 }
  0xca   :  { %v92_v44 = vmul.f32 %v123_v42, %v91_v43 }
  0xcc   :  { %v93_v45 = vmul.f32 0.5, %v92_v44 }
  0xce   :  { %v94_v46 = vsub.f32 1.5, %v93_v45 }
  0xd0   :  { %v95_v47 = vmul.f32 %v123_v42, %v94_v46 }
  0xd2   :  { %v99_v49 = vsel %vm98_vm3, %v123_v42, %v95_v47 }
  0xd3   :  { %v100_v50 = vmul.f32 %v99_v49, %v80_v32 }
  0xd5   :  { %v105_v52 = vmul.f32 %v118_v48, %v100_v50 }
  0xd7   :  { %v110_v53 = vadd.f32 %v119_v51, %v105_v52 }
  0xd9   :  { %v111_v54 = vmax.f32 %v110_v53, 0.0 }
  0xdb   :  { %112 = vst [vmem:[%s214_s4] sm:$0xff] %v111_v54 }

// kernel: simsiam_forward.13
= control target key start
LH: loop header
LB: loop body
LE: loop exit
PB: predicated region body
PF: predicated region fallthrough
CT: control target
= control target key end

     0   :  { %vm21_vm0 = vcmask 261120   ;;  %v129_v2 = vmov 0.0   ;;  %v130_v18 = vmov 8.0   ;;  %s221_s1 = inlined_call_operand.vmem [shape: f32[128,32], index: 1, kind: input, shape index: {}]   ;;  %s222_s2 = inlined_call_operand.vmem [shape: f32[1,32], index: 2, kind: input, shape index: {}]   ;;  %s223_s3 = inlined_call_operand.vmem [shape: f32[1,32], index: 3, kind: input, shape index: {}]   ;;  %s224_s0 = inlined_call_operand.vmem [shape: f32[8,128], index: 0, kind: input, shape index: {}]   ;;  %s225_s4 = inlined_call_operand.vmem [shape: f32[8,32], index: 4, kind: output, shape index: {}]  }
   0x1   :  { %v40_v0 = vld [vmem:[%s221_s1 + $0x78] sm:$0xff]  ;;  %v39_v1 = vld [vmem:[%s221_s1 + $0x70] sm:$0xff]  ;;  %22 = vst.msk [vmem:[#allocation2] sm:$0xff] %vm21_vm0, %v129_v2  ;;  %v38_v3 = vld [vmem:[%s221_s1 + $0x68] sm:$0xff]  ;;  %125 = vrcp.f32 %v130_v18 }
   0x2   :  { %41 = vmatpush.msra.mxu0 %v40_v0  ;;  %v37_v4 = vld [vmem:[%s221_s1 + $0x60] sm:$0xff]  ;;  %v36_v5 = vld [vmem:[%s221_s1 + $0x58] sm:$0xff]  ;;  %v35_v6 = vld [vmem:[%s221_s1 + $0x50] sm:$0xff] }
   0x3   :  { %v34_v7 = vld [vmem:[%s221_s1 + $0x48] sm:$0xff]  ;;  %v33_v8 = vld [vmem:[%s221_s1 + $0x40] sm:$0xff]  ;;  %v32_v9 = vld [vmem:[%s221_s1 + $0x38] sm:$0xff] }
   0x4   :  { %42 = vmatpush.msra.mxu0 %v39_v1  ;;  %v31_v10 = vld [vmem:[%s221_s1 + $0x30] sm:$0xff]  ;;  %v30_v11 = vld [vmem:[%s221_s1 + $0x28] sm:$0xff]  ;;  %v29_v12 = vld [vmem:[%s221_s1 + $0x20] sm:$0xff] }
   0x5   :  { %v28_v13 = vld [vmem:[%s221_s1 + $0x18] sm:$0xff]  ;;  %v27_v14 = vld [vmem:[%s221_s1 + $0x10] sm:$0xff]  ;;  %v26_v15 = vld [vmem:[%s221_s1 + $0x8] sm:$0xff] }
   0x6   :  { %43 = vmatpush.msra.mxu0 %v38_v3  ;;  %v25_v16 = vld [vmem:[%s221_s1] sm:$0xff] }
   0x7   :  { %v24_v17 = vld [vmem:[%s224_s0] sm:$0xff]  ;;  %v126_v22 = vpop.eup %125 }
   0x8   :  { %44 = vmatpush.msra.mxu0 %v37_v4  ;;  %v23_v19 = vld [vmem:[#allocation2] sm:$0xff]  ;;  %v76_v23 = vmul.f32 8.0, %v126_v22  ;;  %vm80_vm1 = vweird.f32 %v126_v22 }
   0x9   :  { %v123_v54 = vld [vmem:[%s222_s2] ss:$0 sm:$0xff] }
   0xa   :  { %45 = vmatpush.msra.mxu0 %v36_v5  ;;  %v77_v24 = vsub.f32 1.0, %v76_v23  ;;  %v124_v57 = vld [vmem:[%s223_s3] ss:$0 sm:$0xff] }
   0xc   :  { %46 = vmatpush.msra.mxu0 %v35_v6  ;;  %v78_v28 = vmul.f32 %v126_v22, %v77_v24 }
   0xe   :  { %47 = vmatpush.msra.mxu0 %v34_v7  ;;  %v79_v31 = vadd.f32 %v126_v22, %v78_v28 }
  0x10   :  { %48 = vmatpush.msra.mxu0 %v33_v8  ;;  %v81_v34 = vsel %vm80_vm1, %v126_v22, %v79_v31 }
  0x12   :  { %49 = vmatpush.msra.mxu0 %v32_v9 }
  0x14   :  { %50 = vmatpush.msra.mxu0 %v31_v10 }
  0x16   :  { %51 = vmatpush.msra.mxu0 %v30_v11 }
  0x18   :  { %52 = vmatpush.msra.mxu0 %v29_v12 }
  0x1a   :  { %53 = vmatpush.msra.mxu0 %v28_v13 }
  0x1c   :  { %54 = vmatpush.msra.mxu0 %v27_v14 }
  0x1e   :  { %55 = vmatpush.msra.mxu0 %v26_v15 }
  0x20   :  { %56 = vmatpush.msra.mxu0 %v25_v16 }
  0x21   :  { %57 = vmatmul.f32.vlgmr.msra.gmra.mxu0 %v24_v17 }
  0x9e   :  { %v58_v20 = vpop.f32.mrf.mxu0 }
  0x9f   :  { %v61_v21 = vadd.f32 %v58_v20, %v23_v19 }
  0xa1   :  { %63 = vst.msk [vmem:[#allocation2] sm:$0xff] %vm21_vm0, %v61_v21 }
  0xa8   :  { %v67_v25 = vld [vmem:[#allocation2] sm:$0xff] }
  0xa9   :  { %v68_v26 = vsel %vm21_vm0, %v67_v25, 0.0 }
  0xaa   :  { %v69_v27 = vrot.slane %v68_v26, 4 }
  0xac   :  { %v70_v29 = vadd.f32 %v69_v27, %v68_v26 }
  0xae   :  { %v71_v30 = vrot.slane %v70_v29, 2 }
  0xb0   :  { %v72_v32 = vadd.f32 %v71_v30, %v70_v29 }
  0xb2   :  { %v73_v33 = vrot.slane %v72_v32, 1 }
  0xb4   :  { %v74_v35 = vadd.f32 %v73_v33, %v72_v32 }
  0xb6   :  { %v82_v36 = vmul.f32 %v81_v34, %v74_v35 }
  0xb8   :  { %v83_v37 = vsub.f32 %v67_v25, %v82_v36 }
  0xba   :  { %v84_v38 = vmul.f32 %v83_v37, %v83_v37 }
  0xbc   :  { %v85_v39 = vsel %vm21_vm0, %v84_v38, 0.0 }
  0xbd   :  { %v86_v40 = vrot.slane %v85_v39, 4 }
  0xbf   :  { %v87_v41 = vadd.f32 %v86_v40, %v85_v39 }
  0xc1   :  { %v88_v42 = vrot.slane %v87_v41, 2 }
  0xc3   :  { %v89_v43 = vadd.f32 %v88_v42, %v87_v41 }
  0xc5   :  { %v90_v44 = vrot.slane %v89_v43, 1 }
  0xc7   :  { %v91_v45 = vadd.f32 %v90_v44, %v89_v43 }
  0xc9   :  { %v92_v46 = vmul.f32 %v91_v45, %v81_v34 }
  0xcb   :  { %v93_v47 = vadd.f32 1e-05, %v92_v46 }
  0xcd   :  { %127 = vrsqrt.f32 %v93_v47  ;;  %vm100_vm3 = vweird.f32 %v93_v47 }
  0xd3   :  { %v128_v48 = vpop.eup %127 }
  0xd4   :  { %v95_v49 = vmul.f32 %v128_v48, %v93_v47  ;;  %vm101_vm2 = vweird.f32 %v128_v48 }
  0xd5   :  { %vm102_vm4 = vmor %vm100_vm3, %vm101_vm2 }
  0xd6   :  { %v96_v50 = vmul.f32 %v128_v48, %v95_v49 }
  0xd8   :  { %v97_v51 = vmul.f32 0.5, %v96_v50 }
  0xda   :  { %v98_v52 = vsub.f32 1.5, %v97_v51 }
  0xdc   :  { %v99_v53 = vmul.f32 %v128_v48, %v98_v52 }
  0xde   :  { %v103_v55 = vsel %vm102_vm4, %v128_v48, %v99_v53 }
  0xdf   :  { %v104_v56 = vmul.f32 %v103_v55, %v83_v37 }
  0xe1   :  { %v109_v58 = vmul.f32 %v123_v54, %v104_v56 }
  0xe3   :  { %v114_v59 = vadd.f32 %v124_v57, %v109_v58 }
  0xe5   :  { %v115_v60 = vmax.f32 %v114_v59, 0.0 }
  0xe7   :  { %116 = vst.msk [vmem:[%s225_s4] sm:$0xff] %vm21_vm0, %v115_v60 }

// kernel: simsiam_forward.14
= control target key start
LH: loop header
LB: loop body
LE: loop exit
PB: predicated region body
PF: predicated region fallthrough
CT: control target
= control target key end

     0   :  { %s166_s0 = inlined_call_operand.vmem [shape: f32[8,32], index: 0, kind: input, shape index: {}]   ;;  %s167_s1 = inlined_call_operand.vmem [shape: f32[32,128], index: 1, kind: input, shape index: {}]   ;;  %s168_s2 = inlined_call_operand.vmem [shape: f32[1,128], index: 2, kind: input, shape index: {}]   ;;  %s169_s3 = inlined_call_operand.vmem [shape: f32[1,128], index: 3, kind: input, shape index: {}]   ;;  %s170_s4 = inlined_call_operand.hbm [shape: f32[8,128], index: 4, kind: output, shape index: {}]  }
   0x1   :  { %v28_v0 = vld [vmem:[%s167_s1 + $0x18] sm:$0xff]  ;;  %v27_v1 = vld [vmem:[%s167_s1 + $0x10] sm:$0xff]  ;;  %v26_v2 = vld [vmem:[%s167_s1 + $0x8] sm:$0xff] }
   0x2   :  { %45 = vmatpush.msra.mxu0 %v28_v0 }
   0x3   :  { %9 = vsyncpa [#allocation4], 0  ;;  %v25_v3 = vld [vmem:[%s167_s1] sm:$0xff]  ;;  %vm29_vm0 = vcmask 261120   ;;  %s116_s29 = smov [#allocation3]   ;;  %s77_s6 = sshll.u32 %s170_s4, 4  ;;  %s78_s6 = int_to_ptr.hbm [resolvable:$true] %s77_s6 }
   0x4   :  { %46 = vmatpush.msra.mxu0 %v27_v1  ;;  %v24_v4 = vld [vmem:[%s166_s0] sm:$0xff]  ;;  %s75_s30 = sshll.u32 %s116_s29, 4  ;;  %s76_s30 = int_to_ptr.vmem [resolvable:$true] %s75_s30 }
   0x5   :  { %v88_v5 = vld [vmem:[%s168_s2] ss:$0 sm:$0xff] }
   0x6   :  { %47 = vmatpush.msra.mxu0 %v26_v2  ;;  %v89_v6 = vld [vmem:[%s169_s3] ss:$0 sm:$0xff] }
   0x8   :  { %48 = vmatpush.msra.mxu0 %v25_v3 }
   0x9   :  { %86 = vmatmul.msk.f32.vlgmr.msra.gmra.mxu0 %vm29_vm0, %v24_v4 }
  0x86   :  { %v50_v7 = vpop.f32.mrf.mxu0 }
  0x87   :  { %v63_v8 = vmul.f32 %v88_v5, %v50_v7 }
  0x89   :  { %v68_v9 = vadd.f32 %v89_v6, %v63_v8 }
  0x8b   :  { %69 = vst [vmem:[#allocation3] sm:$0xff] %v68_v9 }
  0x8c   :  { %80 = dma.vmem_to_hbm [thread:$0]  %s76_s30, 128, %s78_s6, [#allocation4]  }
  0x8d   :  { %114 = dma.done.wait [#allocation4], 128  }
  0x8e   :  { %115 = vsyncadd [#allocation4], 4294967168 }
  0x8f   :  { %85 = vsyncpa [#allocation4], 1 }

// kernel: simsiam_forward.17
= control target key start
LH: loop header
LB: loop body
LE: loop exit
PB: predicated region body
PF: predicated region fallthrough
CT: control target
= control target key end

     0   :  { %v123_v17 = vmov 8.0   ;;  %s209_s1 = inlined_call_operand.vmem [shape: f32[128,128], index: 1, kind: input, shape index: {}]   ;;  %s210_s2 = inlined_call_operand.vmem [shape: f32[1,128], index: 2, kind: input, shape index: {}]   ;;  %s211_s3 = inlined_call_operand.vmem [shape: f32[1,128], index: 3, kind: input, shape index: {}]   ;;  %s212_s0 = inlined_call_operand.vmem [shape: f32[8,128], index: 0, kind: input, shape index: {}]   ;;  %s213_s4 = inlined_call_operand.vmem [shape: f32[8,128], index: 4, kind: output, shape index: {}]  }
   0x1   :  { %v39_v0 = vld [vmem:[%s209_s1 + $0x78] sm:$0xff]  ;;  %v38_v1 = vld [vmem:[%s209_s1 + $0x70] sm:$0xff]  ;;  %v37_v2 = vld [vmem:[%s209_s1 + $0x68] sm:$0xff]  ;;  %119 = vrcp.f32 %v123_v17 }
   0x2   :  { %40 = vmatpush.msra.mxu0 %v39_v0  ;;  %v36_v3 = vld [vmem:[%s209_s1 + $0x60] sm:$0xff]  ;;  %v35_v4 = vld [vmem:[%s209_s1 + $0x58] sm:$0xff]  ;;  %v34_v5 = vld [vmem:[%s209_s1 + $0x50] sm:$0xff] }
   0x3   :  { %v33_v6 = vld [vmem:[%s209_s1 + $0x48] sm:$0xff]  ;;  %v32_v7 = vld [vmem:[%s209_s1 + $0x40] sm:$0xff]  ;;  %v31_v8 = vld [vmem:[%s209_s1 + $0x38] sm:$0xff] }
   0x4   :  { %41 = vmatpush.msra.mxu0 %v38_v1  ;;  %v30_v9 = vld [vmem:[%s209_s1 + $0x30] sm:$0xff]  ;;  %v29_v10 = vld [vmem:[%s209_s1 + $0x28] sm:$0xff]  ;;  %v28_v11 = vld [vmem:[%s209_s1 + $0x20] sm:$0xff] }
   0x5   :  { %v27_v12 = vld [vmem:[%s209_s1 + $0x18] sm:$0xff]  ;;  %v26_v13 = vld [vmem:[%s209_s1 + $0x10] sm:$0xff]  ;;  %v25_v14 = vld [vmem:[%s209_s1 + $0x8] sm:$0xff] }
   0x6   :  { %42 = vmatpush.msra.mxu0 %v37_v2  ;;  %v24_v15 = vld [vmem:[%s209_s1] sm:$0xff] }
   0x7   :  { %v23_v16 = vld [vmem:[%s212_s0] sm:$0xff]  ;;  %v120_v18 = vpop.eup %119 }
   0x8   :  { %43 = vmatpush.msra.mxu0 %v36_v3  ;;  %v73_v19 = vmul.f32 8.0, %v120_v18  ;;  %vm77_vm0 = vweird.f32 %v120_v18  ;;  %v117_v48 = vld [vmem:[%s210_s2] ss:$0 sm:$0xff] }
   0x9   :  { %v118_v51 = vld [vmem:[%s211_s3] ss:$0 sm:$0xff] }
   0xa   :  { %44 = vmatpush.msra.mxu0 %v35_v4  ;;  %v74_v20 = vsub.f32 1.0, %v73_v19 }
   0xc   :  { %45 = vmatpush.msra.mxu0 %v34_v5  ;;  %v75_v23 = vmul.f32 %v120_v18, %v74_v20 }
   0xe   :  { %46 = vmatpush.msra.mxu0 %v33_v6  ;;  %v76_v26 = vadd.f32 %v120_v18, %v75_v23 }
  0x10   :  { %47 = vmatpush.msra.mxu0 %v32_v7  ;;  %v78_v29 = vsel %vm77_vm0, %v120_v18, %v76_v26 }
  0x12   :  { %48 = vmatpush.msra.mxu0 %v31_v8 }
  0x14   :  { %49 = vmatpush.msra.mxu0 %v30_v9 }
  0x16   :  { %50 = vmatpush.msra.mxu0 %v29_v10 }
  0x18   :  { %51 = vmatpush.msra.mxu0 %v28_v11 }
  0x1a   :  { %52 = vmatpush.msra.mxu0 %v27_v12 }
  0x1c   :  { %53 = vmatpush.msra.mxu0 %v26_v13 }
  0x1e   :  { %54 = vmatpush.msra.mxu0 %v25_v14 }
  0x20   :  { %55 = vmatpush.msra.mxu0 %v24_v15 }
  0x21   :  { %56 = vmatmul.f32.vlgmr.msra.gmra.mxu0 %v23_v16 }
  0x9e   :  { %v57_v21 = vpop.f32.mrf.mxu0 }
  0x9f   :  { %v66_v22 = vrot.slane %v57_v21, 4 }
  0xa1   :  { %v67_v24 = vadd.f32 %v66_v22, %v57_v21 }
  0xa3   :  { %v68_v25 = vrot.slane %v67_v24, 2 }
  0xa5   :  { %v69_v27 = vadd.f32 %v68_v25, %v67_v24 }
  0xa7   :  { %v70_v28 = vrot.slane %v69_v27, 1 }
  0xa9   :  { %v71_v30 = vadd.f32 %v70_v28, %v69_v27 }
  0xab   :  { %v79_v31 = vmul.f32 %v78_v29, %v71_v30 }
  0xad   :  { %v80_v32 = vsub.f32 %v57_v21, %v79_v31 }
  0xaf   :  { %v81_v33 = vmul.f32 %v80_v32, %v80_v32 }
  0xb1   :  { %v82_v34 = vrot.slane %v81_v33, 4 }
  0xb3   :  { %v83_v35 = vadd.f32 %v82_v34, %v81_v33 }
  0xb5   :  { %v84_v36 = vrot.slane %v83_v35, 2 }
  0xb7   :  { %v85_v37 = vadd.f32 %v84_v36, %v83_v35 }
  0xb9   :  { %v86_v38 = vrot.slane %v85_v37, 1 }
  0xbb   :  { %v87_v39 = vadd.f32 %v86_v38, %v85_v37 }
  0xbd   :  { %v88_v40 = vmul.f32 %v87_v39, %v78_v29 }
  0xbf   :  { %v89_v41 = vadd.f32 1e-05, %v88_v40 }
  0xc1   :  { %121 = vrsqrt.f32 %v89_v41  ;;  %vm96_vm2 = vweird.f32 %v89_v41 }
  0xc7   :  { %v122_v42 = vpop.eup %121 }
  0xc8   :  { %v91_v43 = vmul.f32 %v122_v42, %v89_v41  ;;  %vm97_vm1 = vweird.f32 %v122_v42 }
  0xc9   :  { %vm98_vm3 = vmor %vm96_vm2, %vm97_vm1 }
  0xca   :  { %v92_v44 = vmul.f32 %v122_v42, %v91_v43 }
  0xcc   :  { %v93_v45 = vmul.f32 0.5, %v92_v44 }
  0xce   :  { %v94_v46 = vsub.f32 1.5, %v93_v45 }
  0xd0   :  { %v95_v47 = vmul.f32 %v122_v42, %v94_v46 }
  0xd2   :  { %v99_v49 = vsel %vm98_vm3, %v122_v42, %v95_v47 }
  0xd3   :  { %v100_v50 = vmul.f32 %v99_v49, %v80_v32 }
  0xd5   :  { %v105_v52 = vmul.f32 %v117_v48, %v100_v50 }
  0xd7   :  { %v110_v53 = vadd.f32 %v118_v51, %v105_v52 }
  0xd9   :  { %111 = vst [vmem:[%s213_s4] sm:$0xff] %v110_v53 }

</bundles_post_ra>
